<compile_context>
chip_gen: v7x
topology: tpu7x:2x2x1
jax: 0.10.0
libtpu: 0.0.40
codegen_flags: <defaults>
</compile_context>

<pallas_src>
import jax
import jax.numpy as jnp
from jax.experimental import pallas as pl
from jax.experimental.pallas import tpu as pltpu

LANE = 128      # vreg lane width (last dim)
SUBLANE = 8     # f32 vreg sublane width (second-to-last dim)


def _round_up(n, m):
    return ((n + m - 1) // m) * m


def _choose_tm(batch, block_m):
    """Pick a batch row-tile: as large as possible (amortize ~0.35us/grid-step)
    while keeping the batch padding waste small (<= ~6%). Multiples of 8 are
    fine since x stays f32 in HBM; use 16 if you switch x/out to bf16 in HBM."""
    if batch <= block_m:
        return _round_up(batch, SUBLANE)
    best_tm = SUBLANE
    best_waste = _round_up(batch, SUBLANE) - batch
    for tm in range(block_m, SUBLANE - 1, -SUBLANE):
        waste = _round_up(batch, tm) - batch
        if waste <= max(SUBLANE, batch // 16):
            return tm
        if waste < best_waste:
            best_tm, best_waste = tm, waste
    return best_tm


def prepare_params(w1, b1, w2, b2):
    """One-time parameter prep: pad lane dims (H, C) to 128 and cast weights to
    bf16. Call once per set of weights and reuse across forwards.

    w1: (D, H), b1: (H,) or (1, H), w2: (H, C), b2: (C,) or (1, C).
    """
    D, H = w1.shape
    C = w2.shape[1]
    # 128 is the native MXU tile on all generations. If H/C grow into the
    # hundreds and the kernel becomes MXU-bound on v6e/v7x, pad to 256 instead.
    H_pad = _round_up(H, LANE)
    C_pad = _round_up(C, LANE)
    w1_p = jnp.zeros((D, H_pad), jnp.bfloat16).at[:, :H].set(w1.astype(jnp.bfloat16))
    b1_p = jnp.zeros((1, H_pad), jnp.float32).at[:, :H].set(
        jnp.reshape(b1, (1, H)).astype(jnp.float32))
    w2_p = jnp.zeros((H_pad, C_pad), jnp.bfloat16).at[:H, :C].set(w2.astype(jnp.bfloat16))
    b2_p = jnp.zeros((1, C_pad), jnp.float32).at[:, :C].set(
        jnp.reshape(b2, (1, C)).astype(jnp.float32))
    return {"w1": w1_p, "b1": b1_p, "w2": w2_p, "b2": b2_p, "num_classes": C}


def simple_nn_kernel(x_ref, w1_ref, b1_ref, w2_ref, b2_ref, out_ref):
    # x_ref:  (TM, D)        f32  -- streamed batch tile (cast to bf16 at the MXU)
    # w1_ref: (D, H_pad)     bf16 -- VMEM-resident
    # b1_ref: (1, H_pad)     f32
    # w2_ref: (H_pad, C_pad) bf16 -- VMEM-resident
    # b2_ref: (1, C_pad)     f32
    # out_ref:(TM, C_pad)    out_dtype (lane-dense -> unmasked stores)
    x_bf = x_ref[...].astype(jnp.bfloat16)
    h = jnp.dot(x_bf, w1_ref[...], preferred_element_type=jnp.float32)
    h = jnp.maximum(h + b1_ref[...], 0.0)                 # bias + ReLU in f32 (VPU)
    y = jnp.dot(h.astype(jnp.bfloat16), w2_ref[...],
                preferred_element_type=jnp.float32)
    out_ref[...] = (y + b2_ref[...]).astype(out_ref.dtype)


def _vmem_limit_bytes(D, H_pad, C_pad, TM, x_itemsize, out_itemsize):
    resident = 2 * (D * H_pad + H_pad * C_pad) + 4 * (H_pad + C_pad)  # bf16 W, f32 b
    streamed = 2 * (TM * D * x_itemsize + TM * C_pad * out_itemsize)  # double-buffered
    # 2x headroom for compiler temporaries / possible double-buffered weights.
    # Clamp to [16, 48] MiB: fits v7x's 64 MiB physical VMEM, plenty on v5e/v6e.
    return int(min(max(2 * (resident + streamed), 16 * 1024 * 1024),
                   48 * 1024 * 1024))


def _resident_spec(shape, single_buffer):
    index_map = lambda i: (0,) * len(shape)
    if single_buffer:
        return pl.BlockSpec(shape, index_map, pipeline_mode=pl.Buffered(1))
    return pl.BlockSpec(shape, index_map)


def _pallas_forward(x_in, w1_p, b1_p, w2_p, b2_p, TM, out_dtype, single_buffer):
    B_pad, D = x_in.shape
    H_pad = w1_p.shape[1]
    C_pad = w2_p.shape[1]
    vmem_limit = _vmem_limit_bytes(D, H_pad, C_pad, TM,
                                   jnp.dtype(x_in.dtype).itemsize,
                                   jnp.dtype(out_dtype).itemsize)
    # TODO(synk): add a K-reduction grid axis (pl.when init/finalize + VMEM f32
    # accumulator) if D ever grows to multi-thousand so W1 no longer fits VMEM.
    return pl.pallas_call(
        simple_nn_kernel,
        out_shape=jax.ShapeDtypeStruct((B_pad, C_pad), out_dtype),
        grid=(B_pad // TM,),
        in_specs=[
            # x streams over batch; full (unpadded) D is a legal block dim.
            pl.BlockSpec((TM, D), lambda i: (i, 0)),
            _resident_spec((D, H_pad), single_buffer),      # W1: VMEM-resident
            _resident_spec((1, H_pad), single_buffer),      # b1
            _resident_spec((H_pad, C_pad), single_buffer),  # W2: VMEM-resident
            _resident_spec((1, C_pad), single_buffer),      # b2
        ],
        out_specs=pl.BlockSpec((TM, C_pad), lambda i: (i, 0)),
        compiler_params=pltpu.CompilerParams(
            dimension_semantics=("parallel",),   # megacore shard over batch tiles
            vmem_limit_bytes=vmem_limit,
        ),
    )(x_in, w1_p, b1_p, w2_p, b2_p)


def simple_nn_forward_prepared(x, params, *, block_m=1024, out_dtype=jnp.float32):
    """Fused fc1 -> ReLU -> fc2 with pre-prepared (padded / bf16) params."""
    B, D = x.shape
    TM = _choose_tm(B, block_m)
    B_pad = _round_up(B, TM)
    # Only the (small, waste-aware) batch remainder is padded; no feature-dim
    # pad and no bf16 copy of x is ever materialized in HBM.
    x_in = x if B_pad == B else jnp.zeros((B_pad, D), x.dtype).at[:B].set(x)
    args = (x_in, params["w1"], params["b1"], params["w2"], params["b2"],
            TM, out_dtype)
    try:
        out_p = _pallas_forward(*args, single_buffer=True)
    except Exception:
        # Some jax versions reject pipeline_mode=pl.Buffered(1); retry with the
        # default double-buffered resident weights (same math, more VMEM).
        out_p = _pallas_forward(*args, single_buffer=False)
    return out_p[:B, :params["num_classes"]]


def simple_nn_forward(x, w1, b1, w2, b2, *, block_m=1024, out_dtype=jnp.float32,
                      force_pallas=False):
    """One-shot convenience wrapper. For repeated inference, call
    prepare_params() once and reuse simple_nn_forward_prepared()."""
    B, D = x.shape
    if not force_pallas and B * D < (1 << 14):
        # Tiny problems: launch + prep overhead dominates; plain XLA wins.
        h = jnp.maximum(x @ w1 + jnp.reshape(b1, (1, -1)), 0.0)
        return (h @ w2 + jnp.reshape(b2, (1, -1))).astype(out_dtype)
    params = prepare_params(w1, b1, w2, b2)
    return simple_nn_forward_prepared(x, params, block_m=block_m,
                                      out_dtype=out_dtype)


def init_params(key, input_size, hidden_size, num_classes):
    # Deterministic init mimicking nn.Linear's U(-1/sqrt(fan_in), 1/sqrt(fan_in)).
    k1, k2, k3, k4 = jax.random.split(key, 4)
    bound1 = 1.0 / (input_size ** 0.5)
    bound2 = 1.0 / (hidden_size ** 0.5)
    w1 = jax.random.uniform(k1, (input_size, hidden_size), jnp.float32, -bound1, bound1)
    b1 = jax.random.uniform(k2, (1, hidden_size), jnp.float32, -bound1, bound1)
    w2 = jax.random.uniform(k3, (hidden_size, num_classes), jnp.float32, -bound2, bound2)
    b2 = jax.random.uniform(k4, (1, num_classes), jnp.float32, -bound2, bound2)
    return w1, b1, w2, b2


if __name__ == "__main__":
    # Small shapes consistent with the module: batch=8, input=16, hidden=32, classes=8
    batch, input_size, hidden_size, num_classes = 8, 16, 32, 8

    key = jax.random.PRNGKey(0)
    kx, kp = jax.random.split(key)
    x = jax.random.normal(kx, (batch, input_size), dtype=jnp.float32)
    w1, b1, w2, b2 = init_params(kp, input_size, hidden_size, num_classes)

    # One-time parameter prep (hoisted out of the per-forward path), then run
    # the Pallas kernel directly (bypassing the tiny-shape XLA shortcut so the
    # kernel itself is exercised).
    params = prepare_params(w1, b1, w2, b2)
    out = simple_nn_forward_prepared(x, params)
    out = jax.block_until_ready(out)

    # Pure-JAX f32 reference (bf16 MXU inputs -> loosened tolerance).
    ref = jnp.maximum(x @ w1 + b1, 0.0) @ w2 + b2
    assert out.shape == (batch, num_classes)
    assert jnp.allclose(out, ref, atol=3e-2, rtol=3e-2), (
        f"max abs err {jnp.max(jnp.abs(out - ref))}")

    print("KERNEL_OK")
</pallas_src>

<mosaic_0001>
module attributes {stable_mosaic.version = 11 : i64} {
  func.func @simple_nn_kernel(%arg0: i32, %arg1: memref<8x16xf32, #tpu.memory_space<vmem>>, %arg2: memref<16x128xbf16, #tpu.memory_space<vmem>>, %arg3: memref<1x128xf32, #tpu.memory_space<vmem>>, %arg4: memref<128x128xbf16, #tpu.memory_space<vmem>>, %arg5: memref<1x128xf32, #tpu.memory_space<vmem>>, %arg6: memref<8x128xf32, #tpu.memory_space<vmem>>) attributes {dimension_semantics = [#tpu.dimension_semantics<parallel>], iteration_bounds = array<i64: 1>, scalar_prefetch = 0 : i64, scratch_operands = 0 : i64, tpu.core_type = #tpu.core_type<tc>, window_params = [{transform_indices = @transform_0, window_bounds = array<i64: 8, 16>}, {pipeline_mode = #tpu.pipeline_mode<synchronous>, transform_indices = @transform_1, window_bounds = array<i64: 16, 128>}, {pipeline_mode = #tpu.pipeline_mode<synchronous>, transform_indices = @transform_2, window_bounds = array<i64: 1, 128>}, {pipeline_mode = #tpu.pipeline_mode<synchronous>, transform_indices = @transform_3, window_bounds = array<i64: 128, 128>}, {pipeline_mode = #tpu.pipeline_mode<synchronous>, transform_indices = @transform_4, window_bounds = array<i64: 1, 128>}, {transform_indices = @transform_5, window_bounds = array<i64: 8, 128>}]} {
    %c0 = arith.constant 0 : index
    %c0_0 = arith.constant 0 : index
    %0 = vector.load %arg1[%c0, %c0_0] : memref<8x16xf32, #tpu.memory_space<vmem>>, vector<8x16xf32>
    %1 = arith.truncf %0 : vector<8x16xf32> to vector<8x16xbf16>
    %c0_1 = arith.constant 0 : index
    %c0_2 = arith.constant 0 : index
    %2 = vector.load %arg2[%c0_1, %c0_2] : memref<16x128xbf16, #tpu.memory_space<vmem>>, vector<16x128xbf16>
    %cst = arith.constant dense<0.000000e+00> : vector<8x128xf32>
    %3 = tpu.matmul %1, %2, %cst {dimension_numbers = #tpu.dot_dimension_numbers<[1], [0], [0], [1], [0, 0, 1, 1], [], []>} : vector<8x16xbf16>, vector<16x128xbf16>, vector<8x128xf32> -> vector<8x128xf32>
    %c0_3 = arith.constant 0 : index
    %c0_4 = arith.constant 0 : index
    %4 = vector.load %arg3[%c0_3, %c0_4] : memref<1x128xf32, #tpu.memory_space<vmem>>, vector<1x128xf32>
    %5 = vector.broadcast %4 : vector<1x128xf32> to vector<8x128xf32>
    %6 = arith.addf %3, %5 : vector<8x128xf32>
    %cst_5 = arith.constant 0.000000e+00 : f32
    %7 = vector.broadcast %cst_5 : f32 to vector<8x128xf32>
    %8 = arith.maximumf %6, %7 : vector<8x128xf32>
    %9 = arith.truncf %8 : vector<8x128xf32> to vector<8x128xbf16>
    %c0_6 = arith.constant 0 : index
    %c0_7 = arith.constant 0 : index
    %10 = vector.load %arg4[%c0_6, %c0_7] : memref<128x128xbf16, #tpu.memory_space<vmem>>, vector<128x128xbf16>
    %cst_8 = arith.constant dense<0.000000e+00> : vector<8x128xf32>
    %11 = tpu.matmul %9, %10, %cst_8 {dimension_numbers = #tpu.dot_dimension_numbers<[1], [0], [0], [1], [0, 0, 1, 1], [], []>} : vector<8x128xbf16>, vector<128x128xbf16>, vector<8x128xf32> -> vector<8x128xf32>
    %c0_9 = arith.constant 0 : index
    %c0_10 = arith.constant 0 : index
    %12 = vector.load %arg5[%c0_9, %c0_10] : memref<1x128xf32, #tpu.memory_space<vmem>>, vector<1x128xf32>
    %13 = vector.broadcast %12 : vector<1x128xf32> to vector<8x128xf32>
    %14 = arith.addf %11, %13 : vector<8x128xf32>
    %c0_11 = arith.constant 0 : index
    %c0_12 = arith.constant 0 : index
    %15 = vector.load %arg6[%c0_11, %c0_12] : memref<8x128xf32, #tpu.memory_space<vmem>>, vector<8x128xf32>
    tpu.vector_store %arg6[%c0_11, %c0_12], %14 {strides = array<i32>} : memref<8x128xf32, #tpu.memory_space<vmem>>, vector<8x128xf32>,
    return
  }
  func.func @transform_0(%arg0: i32) -> (i32, i32) {
    %c0_i32 = arith.constant 0 : i32
    %c0_i32_0 = arith.constant 0 : i32
    return %arg0, %c0_i32 : i32, i32
  }
  func.func @transform_1(%arg0: i32) -> (i32, i32) {
    %c0_i32 = arith.constant 0 : i32
    %c0_i32_0 = arith.constant 0 : i32
    %c0_i32_1 = arith.constant 0 : i32
    return %c0_i32, %c0_i32_0 : i32, i32
  }
  func.func @transform_2(%arg0: i32) -> (i32, i32) {
    %c0_i32 = arith.constant 0 : i32
    %c0_i32_0 = arith.constant 0 : i32
    %c0_i32_1 = arith.constant 0 : i32
    return %c0_i32, %c0_i32_0 : i32, i32
  }
  func.func @transform_3(%arg0: i32) -> (i32, i32) {
    %c0_i32 = arith.constant 0 : i32
    %c0_i32_0 = arith.constant 0 : i32
    %c0_i32_1 = arith.constant 0 : i32
    return %c0_i32, %c0_i32_0 : i32, i32
  }
  func.func @transform_4(%arg0: i32) -> (i32, i32) {
    %c0_i32 = arith.constant 0 : i32
    %c0_i32_0 = arith.constant 0 : i32
    %c0_i32_1 = arith.constant 0 : i32
    return %c0_i32, %c0_i32_0 : i32, i32
  }
  func.func @transform_5(%arg0: i32) -> (i32, i32) {
    %c0_i32 = arith.constant 0 : i32
    %c0_i32_0 = arith.constant 0 : i32
    return %arg0, %c0_i32 : i32, i32
  }
}

module attributes {stable_mosaic.version = 11 : i64} {
  func.func @simple_nn_kernel(%arg0: i32, %arg1: memref<8x16xf32, #tpu.memory_space<vmem>>, %arg2: memref<16x128xbf16, #tpu.memory_space<vmem>>, %arg3: memref<1x128xf32, #tpu.memory_space<vmem>>, %arg4: memref<128x128xbf16, #tpu.memory_space<vmem>>, %arg5: memref<1x128xf32, #tpu.memory_space<vmem>>, %arg6: memref<8x128xf32, #tpu.memory_space<vmem>>) attributes {dimension_semantics = [#tpu.dimension_semantics<parallel>], iteration_bounds = array<i64: 1>, scalar_prefetch = 0 : i64, scratch_operands = 0 : i64, tpu.core_type = #tpu.core_type<tc>, window_params = [{transform_indices = @transform_0, window_bounds = array<i64: 8, 16>}, {pipeline_mode = #tpu.pipeline_mode<synchronous>, transform_indices = @transform_1, window_bounds = array<i64: 16, 128>}, {pipeline_mode = #tpu.pipeline_mode<synchronous>, transform_indices = @transform_2, window_bounds = array<i64: 1, 128>}, {pipeline_mode = #tpu.pipeline_mode<synchronous>, transform_indices = @transform_3, window_bounds = array<i64: 128, 128>}, {pipeline_mode = #tpu.pipeline_mode<synchronous>, transform_indices = @transform_4, window_bounds = array<i64: 1, 128>}, {transform_indices = @transform_5, window_bounds = array<i64: 8, 128>}]} {
    %c0 = arith.constant 0 : index
    %c0_0 = arith.constant 0 : index
    %0 = vector.load %arg1[%c0, %c0_0] : memref<8x16xf32, #tpu.memory_space<vmem>>, vector<8x16xf32>
    %1 = arith.truncf %0 : vector<8x16xf32> to vector<8x16xbf16>
    %c0_1 = arith.constant 0 : index
    %c0_2 = arith.constant 0 : index
    %2 = vector.load %arg2[%c0_1, %c0_2] : memref<16x128xbf16, #tpu.memory_space<vmem>>, vector<16x128xbf16>
    %cst = arith.constant dense<0.000000e+00> : vector<8x128xf32>
    %3 = tpu.matmul %1, %2, %cst {dimension_numbers = #tpu.dot_dimension_numbers<[1], [0], [0], [1], [0, 0, 1, 1], [], []>} : vector<8x16xbf16>, vector<16x128xbf16>, vector<8x128xf32> -> vector<8x128xf32>
    %c0_3 = arith.constant 0 : index
    %c0_4 = arith.constant 0 : index
    %4 = vector.load %arg3[%c0_3, %c0_4] : memref<1x128xf32, #tpu.memory_space<vmem>>, vector<1x128xf32>
    %5 = vector.broadcast %4 : vector<1x128xf32> to vector<8x128xf32>
    %6 = arith.addf %3, %5 : vector<8x128xf32>
    %cst_5 = arith.constant 0.000000e+00 : f32
    %7 = vector.broadcast %cst_5 : f32 to vector<8x128xf32>
    %8 = arith.maximumf %6, %7 : vector<8x128xf32>
    %9 = arith.truncf %8 : vector<8x128xf32> to vector<8x128xbf16>
    %c0_6 = arith.constant 0 : index
    %c0_7 = arith.constant 0 : index
    %10 = vector.load %arg4[%c0_6, %c0_7] : memref<128x128xbf16, #tpu.memory_space<vmem>>, vector<128x128xbf16>
    %cst_8 = arith.constant dense<0.000000e+00> : vector<8x128xf32>
    %11 = tpu.matmul %9, %10, %cst_8 {dimension_numbers = #tpu.dot_dimension_numbers<[1], [0], [0], [1], [0, 0, 1, 1], [], []>} : vector<8x128xbf16>, vector<128x128xbf16>, vector<8x128xf32> -> vector<8x128xf32>
    %c0_9 = arith.constant 0 : index
    %c0_10 = arith.constant 0 : index
    %12 = vector.load %arg5[%c0_9, %c0_10] : memref<1x128xf32, #tpu.memory_space<vmem>>, vector<1x128xf32>
    %13 = vector.broadcast %12 : vector<1x128xf32> to vector<8x128xf32>
    %14 = arith.addf %11, %13 : vector<8x128xf32>
    %c0_11 = arith.constant 0 : index
    %c0_12 = arith.constant 0 : index
    %15 = vector.load %arg6[%c0_11, %c0_12] : memref<8x128xf32, #tpu.memory_space<vmem>>, vector<8x128xf32>
    tpu.vector_store %arg6[%c0_11, %c0_12], %14 {strides = array<i32>} : memref<8x128xf32, #tpu.memory_space<vmem>>, vector<8x128xf32>,
    return
  }
  func.func @transform_0(%arg0: i32) -> (i32, i32) {
    %c0_i32 = arith.constant 0 : i32
    %c0_i32_0 = arith.constant 0 : i32
    return %arg0, %c0_i32 : i32, i32
  }
  func.func @transform_1(%arg0: i32) -> (i32, i32) {
    %c0_i32 = arith.constant 0 : i32
    %c0_i32_0 = arith.constant 0 : i32
    %c0_i32_1 = arith.constant 0 : i32
    return %c0_i32, %c0_i32_0 : i32, i32
  }
  func.func @transform_2(%arg0: i32) -> (i32, i32) {
    %c0_i32 = arith.constant 0 : i32
    %c0_i32_0 = arith.constant 0 : i32
    %c0_i32_1 = arith.constant 0 : i32
    return %c0_i32, %c0_i32_0 : i32, i32
  }
  func.func @transform_3(%arg0: i32) -> (i32, i32) {
    %c0_i32 = arith.constant 0 : i32
    %c0_i32_0 = arith.constant 0 : i32
    %c0_i32_1 = arith.constant 0 : i32
    return %c0_i32, %c0_i32_0 : i32, i32
  }
  func.func @transform_4(%arg0: i32) -> (i32, i32) {
    %c0_i32 = arith.constant 0 : i32
    %c0_i32_0 = arith.constant 0 : i32
    %c0_i32_1 = arith.constant 0 : i32
    return %c0_i32, %c0_i32_0 : i32, i32
  }
  func.func @transform_5(%arg0: i32) -> (i32, i32) {
    %c0_i32 = arith.constant 0 : i32
    %c0_i32_0 = arith.constant 0 : i32
    return %arg0, %c0_i32 : i32, i32
  }
}

</mosaic_0001>

<bundles_post_ra>
// kernel: tpu_custom_call.1
= control target key start
LH: loop header
LB: loop body
LE: loop exit
PB: predicated region body
PF: predicated region fallthrough
CT: control target
= control target key end

     0   :  { %10 = vsyncpa [#allocation3], 0  ;;  %s510_s0 = inlined_call_operand.hbm [shape: f32[8,16], index: 0, kind: input, shape index: {}]   ;;  %s511_s1 = inlined_call_operand.hbm [shape: bf16[16,128], index: 1, kind: input, shape index: {}]   ;;  %s512_s2 = inlined_call_operand.vmem [shape: f32[1,128], index: 2, kind: input, shape index: {}]   ;;  %s513_s3 = inlined_call_operand.hbm [shape: bf16[128,128], index: 3, kind: input, shape index: {}]   ;;  %s514_s4 = inlined_call_operand.vmem [shape: f32[1,128], index: 4, kind: input, shape index: {}]   ;;  %s515_s5 = inlined_call_operand.hbm [shape: f32[8,128], index: 5, kind: output, shape index: {}]  }
   0x1   :  { %11 = vsyncpa [#allocation6], 0 }
   0x2   :  { %12 = vsyncpa [#allocation4], 0  ;;  %s412_s18 = smov [#allocation5]   ;;  %s318_s22 = scalar_lea.hbm %s511_s1, 128 }
   0x3   :  { %s28_s19 = sshll.u32 %s412_s18, 4  ;;  %p319_p0 = scmp.ne.s32.totalorder %s511_s1, %s318_s22  ;;  %s29_s19 = int_to_ptr.vmem [resolvable:$true] %s28_s19 }
   0x4   :  { %p322_p1 = scmp.lt.u32.totalorder %s318_s22, %s511_s1 }
   0x6   :  { %p324_p2 = pnand %p322_p1, %p319_p0 }
   0x8   :  { %327 = shalt.err (!%p324_p2)
}
   0x9   :  { %s328_s27 = scalar_lea.vmem %s29_s19, 128  ;;  %p333_p4 = scmp.lt.s32.totalorder %s29_s19, %s29_s19 }
   0xa   :  { %p329_p3 = scmp.ne.s32.totalorder %s29_s19, %s328_s27  ;;  %p334_p5 = scmp.lt.s32.totalorder %s328_s27, %s328_s27 }
   0xc   :  { %p335_p6 = por %p334_p5, %p333_p4 }
   0xe   :  { %p336_p7 = pnand %p335_p6, %p329_p3 }
  0x10   :  { %339 = shalt.err (!%p336_p7)
}
  0x11   :  { %s413_s28 = smov 64   ;;  %s414_s29 = smov 4  }
  0x12   :  { %34 = dma.hbm_to_vmem [thread:$0]  %s511_s1, 128, %s29_s19, [#allocation6], %s413_s28, %s413_s28, %s414_s29  }
  0x13   :  { %s415_s7 = smov [#allocation2]   ;;  %s416_s9 = smov [#allocation7]  }
  0x14   :  { %s19_s8 = sshll.u32 %s415_s7, 4  ;;  %s42_s10 = sshll.u32 %s416_s9, 4  ;;  %s20_s8 = int_to_ptr.vmem [resolvable:$true] %s19_s8  ;;  %s43_s10 = int_to_ptr.vmem [resolvable:$true] %s42_s10 }
  0x15   :  { %s340_s13 = scalar_lea.hbm %s510_s0, 128 }
  0x16   :  { %p341_p8 = scmp.ne.s32.totalorder %s510_s0, %s340_s13  ;;  %p344_p9 = scmp.lt.u32.totalorder %s340_s13, %s510_s0 }
  0x18   :  { %p346_p10 = pnand %p344_p9, %p341_p8 }
  0x1a   :  { %349 = shalt.err (!%p346_p10)
}
  0x1b   :  { %s350_s1 = scalar_lea.vmem %s20_s8, 128  ;;  %p355_p12 = scmp.lt.s32.totalorder %s20_s8, %s20_s8 }
  0x1c   :  { %p351_p11 = scmp.ne.s32.totalorder %s20_s8, %s350_s1  ;;  %p356_p13 = scmp.lt.s32.totalorder %s350_s1, %s350_s1 }
  0x1e   :  { %p357_p0 = por %p356_p13, %p355_p12 }
  0x20   :  { %p358_p1 = pnand %p357_p0, %p351_p11 }
  0x22   :  { %361 = shalt.err (!%p358_p1)
}
  0x23   :  { %22 = dma.hbm_to_vmem [thread:$0]  %s510_s0, 128, %s20_s8, [#allocation3]  }
  0x24   :  { %s362_s22 = scalar_lea.hbm %s513_s3, 1024 }
  0x25   :  { %p363_p2 = scmp.ne.s32.totalorder %s513_s3, %s362_s22  ;;  %p366_p3 = scmp.lt.u32.totalorder %s362_s22, %s513_s3 }
  0x27   :  { %p368_p4 = pnand %p366_p3, %p363_p2 }
  0x29   :  { %371 = shalt.err (!%p368_p4)
}
  0x2a   :  { %s372_s27 = scalar_lea.vmem %s43_s10, 1024  ;;  %p377_p6 = scmp.lt.s32.totalorder %s43_s10, %s43_s10 }
  0x2b   :  { %p373_p5 = scmp.ne.s32.totalorder %s43_s10, %s372_s27  ;;  %p378_p7 = scmp.lt.s32.totalorder %s372_s27, %s372_s27 }
  0x2d   :  { %p379_p8 = por %p378_p7, %p377_p6 }
  0x2f   :  { %p380_p9 = pnand %p379_p8, %p373_p5 }
  0x31   :  { %383 = shalt.err (!%p380_p9)
}
  0x32   :  { %48 = dma.hbm_to_vmem [thread:$0]  %s513_s3, 1024, %s43_s10, [#allocation6], %s413_s28, %s413_s28, %s414_s29  }
  0x33   :  { %406 = dma.done.wait [#allocation3], 128  }
  0x34   :  { %407 = vsyncadd [#allocation3], 4294967168 }
  0x35   :  { %408 = dma.done.wait [#allocation6], 1152  }
  0x36   :  { %409 = vsyncadd [#allocation6], 4294966144  ;;  %v417_v0 = vmov 0.0   ;;  %vm418_vm0 = vmmov 0   ;;  %v309_v1 = vld [vmem:[#allocation5] sm:$0xff]   ;;  %v61_v2 = vld [vmem:[#allocation2] sm:$0xff] }
  0x37   :  { %275 = vmatprep.subr.bf16.mxu0 %v417_v0  ;;  %277 = vmatprep.mubr.msk.bf16.mxu0 %vm418_vm0, %v417_v0  ;;  %v62_v3 = vpack.c.bf16 %v61_v2, %v61_v2  ;;  %vm78_vm1 = vcmask 130048   ;;  %v310_v4 = vld [vmem:[#allocation7] sm:$0xff]   ;;  %v311_v5 = vld [vmem:[#allocation7 + $0x8] sm:$0xff]   ;;  %v312_v6 = vld [vmem:[#allocation7 + $0x10] sm:$0xff]   ;;  %s419_s7 = smov [#allocation8]  }
  0x38   :  { %281 = vmatprep.subr.bf16.mxu1 %v417_v0  ;;  %297 = vmatprep.mubr.msk.bf16.mxu1 %vm418_vm0, %v417_v0  ;;  %v313_v7 = vld [vmem:[#allocation7 + $0x18] sm:$0xff]   ;;  %v314_v8 = vld [vmem:[#allocation7 + $0x20] sm:$0xff]   ;;  %v315_v9 = vld [vmem:[#allocation7 + $0x28] sm:$0xff]   ;;  %s242_s8 = sshll.u32 %s419_s7, 4  ;;  %s243_s8 = int_to_ptr.vmem [resolvable:$true] %s242_s8 }
  0x39   :  { %276 = vmatpush3.bf16.msra.mxu0 %v309_v1  ;;  %282 = vmatpush3.bf16.msra.mxu1 %v310_v4  ;;  %v316_v10 = vld [vmem:[#allocation7 + $0x30] sm:$0xff]   ;;  %v317_v11 = vld [vmem:[#allocation7 + $0x38] sm:$0xff]   ;;  %p389_p11 = scmp.lt.s32.totalorder %s243_s8, %s243_s8 }
  0x3a   :  { %283 = vmatprep.subr.bf16.mxu1 %v417_v0  ;;  %v252_v12 = vld [vmem:[%s512_s2] ss:$0 sm:$0xff]  ;;  %s384_s2 = scalar_lea.vmem %s243_s8, 128 }
  0x3b   :  { %v255_v20 = vld [vmem:[%s514_s4] ss:$0 sm:$0xff]  ;;  %p385_p10 = scmp.ne.s32.totalorder %s243_s8, %s384_s2  ;;  %p390_p12 = scmp.lt.s32.totalorder %s384_s2, %s384_s2 }
  0x3c   :  { %278 = vmatmul.mubr.msk.bf16.vlgmr.msra.gmra.mrb[0].mxu0 %vm78_vm1, %v62_v3 }
  0x3d   :  { %284 = vmatpush3.bf16.msra.mxu1 %v311_v5  ;;  %p391_p13 = por %p390_p12, %p389_p11 }
  0x3e   :  { %285 = vmatprep.subr.bf16.mxu1 %v417_v0 }
  0x3f   :  { %p392_p0 = pnand %p391_p13, %p385_p10 }
  0x41   :  { %286 = vmatpush3.bf16.msra.mxu1 %v312_v6 }
  0x42   :  { %287 = vmatprep.subr.bf16.mxu1 %v417_v0 }
  0x45   :  { %288 = vmatpush3.bf16.msra.mxu1 %v313_v7 }
  0x46   :  { %289 = vmatprep.subr.bf16.mxu1 %v417_v0 }
  0x49   :  { %290 = vmatpush3.bf16.msra.mxu1 %v314_v8 }
  0x4a   :  { %291 = vmatprep.subr.bf16.mxu1 %v417_v0 }
  0x4d   :  { %292 = vmatpush3.bf16.msra.mxu1 %v315_v9 }
  0x4e   :  { %293 = vmatprep.subr.bf16.mxu1 %v417_v0 }
  0x51   :  { %294 = vmatpush3.bf16.msra.mxu1 %v316_v10 }
  0x52   :  { %295 = vmatprep.subr.bf16.mxu1 %v417_v0 }
  0x55   :  { %296 = vmatpush3.bf16.msra.mxu1 %v317_v11 }
 0x10f   :  { %v116_v13 = vpop.f32.mrb[0].mxu0 }
 0x110   :  { %v117_v14 = vadd.f32 %v252_v12, %v116_v13  ;;  %v279_v15 = vpop.f32.mrb[1].mxu0 }
 0x111   :  { %v119_v16 = vpop.f32.mrb[2].mxu0 }
 0x112   :  { %v122_v17 = vmax.f32 %v117_v14, 0.0  ;;  %v280_v18 = vpop.f32.mrb[3].mxu0 }
 0x114   :  { %v123_v19 = vpack.c.bf16 %v122_v17, %v122_v17 }
 0x116   :  { %298 = vmatmul.mubr.bf16.vlgmr.msra.gmra.mrb[0].mxu1 %v123_v19 }
 0x1e9   :  { %v229_v21 = vpop.f32.mrb[0].mxu1 }
 0x1ea   :  { %v230_v22 = vadd.f32 %v255_v20, %v229_v21  ;;  %v299_v23 = vpop.f32.mrb[1].mxu1 }
 0x1eb   :  { %v232_v24 = vpop.f32.mrb[2].mxu1 }
 0x1ec   :  { %235 = vst [vmem:[#allocation8] sm:$0xff] %v230_v22  ;;  %v300_v25 = vpop.f32.mrb[3].mxu1 }
 0x1ed   :  { %395 = shalt.err (!%p392_p0)
}
 0x1ee   :  { %s396_s4 = scalar_lea.hbm %s515_s5, 128 }
 0x1ef   :  { %p397_p1 = scmp.ne.s32.totalorder %s515_s5, %s396_s4  ;;  %p400_p2 = scmp.lt.u32.totalorder %s396_s4, %s515_s5 }
 0x1f1   :  { %p402_p3 = pnand %p400_p2, %p397_p1 }
 0x1f3   :  { %405 = shalt.err (!%p402_p3)
}
 0x1f4   :  { %245 = dma.vmem_to_hbm [thread:$0]  %s243_s8, 128, %s515_s5, [#allocation4]  }
 0x1f5   :  { %410 = dma.done.wait [#allocation4], 128  }
 0x1f6   :  { %411 = vsyncadd [#allocation4], 4294967168 }
 0x1f7   :  { %249 = vsyncpa [#allocation3], 1 }
 0x1f8   :  { %250 = vsyncpa [#allocation6], 1 }
 0x1f9   :  { %251 = vsyncpa [#allocation4], 1 }

// kernel: tpu_custom_call.1
= control target key start
LH: loop header
LB: loop body
LE: loop exit
PB: predicated region body
PF: predicated region fallthrough
CT: control target
= control target key end

     0   :  { %10 = vsyncpa [#allocation3], 0  ;;  %s510_s0 = inlined_call_operand.hbm [shape: f32[8,16], index: 0, kind: input, shape index: {}]   ;;  %s511_s1 = inlined_call_operand.hbm [shape: bf16[16,128], index: 1, kind: input, shape index: {}]   ;;  %s512_s2 = inlined_call_operand.vmem [shape: f32[1,128], index: 2, kind: input, shape index: {}]   ;;  %s513_s3 = inlined_call_operand.hbm [shape: bf16[128,128], index: 3, kind: input, shape index: {}]   ;;  %s514_s4 = inlined_call_operand.vmem [shape: f32[1,128], index: 4, kind: input, shape index: {}]   ;;  %s515_s5 = inlined_call_operand.hbm [shape: f32[8,128], index: 5, kind: output, shape index: {}]  }
   0x1   :  { %11 = vsyncpa [#allocation6], 0 }
   0x2   :  { %12 = vsyncpa [#allocation4], 0  ;;  %s412_s18 = smov [#allocation5]   ;;  %s318_s22 = scalar_lea.hbm %s511_s1, 128 }
   0x3   :  { %s28_s19 = sshll.u32 %s412_s18, 4  ;;  %p319_p0 = scmp.ne.s32.totalorder %s511_s1, %s318_s22  ;;  %s29_s19 = int_to_ptr.vmem [resolvable:$true] %s28_s19 }
   0x4   :  { %p322_p1 = scmp.lt.u32.totalorder %s318_s22, %s511_s1 }
   0x6   :  { %p324_p2 = pnand %p322_p1, %p319_p0 }
   0x8   :  { %327 = shalt.err (!%p324_p2)
}
   0x9   :  { %s328_s27 = scalar_lea.vmem %s29_s19, 128  ;;  %p333_p4 = scmp.lt.s32.totalorder %s29_s19, %s29_s19 }
   0xa   :  { %p329_p3 = scmp.ne.s32.totalorder %s29_s19, %s328_s27  ;;  %p334_p5 = scmp.lt.s32.totalorder %s328_s27, %s328_s27 }
   0xc   :  { %p335_p6 = por %p334_p5, %p333_p4 }
   0xe   :  { %p336_p7 = pnand %p335_p6, %p329_p3 }
  0x10   :  { %339 = shalt.err (!%p336_p7)
}
  0x11   :  { %s413_s28 = smov 64   ;;  %s414_s29 = smov 4  }
  0x12   :  { %34 = dma.hbm_to_vmem [thread:$0]  %s511_s1, 128, %s29_s19, [#allocation6], %s413_s28, %s413_s28, %s414_s29  }
  0x13   :  { %s415_s7 = smov [#allocation2]   ;;  %s416_s9 = smov [#allocation7]  }
  0x14   :  { %s19_s8 = sshll.u32 %s415_s7, 4  ;;  %s42_s10 = sshll.u32 %s416_s9, 4  ;;  %s20_s8 = int_to_ptr.vmem [resolvable:$true] %s19_s8  ;;  %s43_s10 = int_to_ptr.vmem [resolvable:$true] %s42_s10 }
  0x15   :  { %s340_s13 = scalar_lea.hbm %s510_s0, 128 }
  0x16   :  { %p341_p8 = scmp.ne.s32.totalorder %s510_s0, %s340_s13  ;;  %p344_p9 = scmp.lt.u32.totalorder %s340_s13, %s510_s0 }
  0x18   :  { %p346_p10 = pnand %p344_p9, %p341_p8 }
  0x1a   :  { %349 = shalt.err (!%p346_p10)
}
  0x1b   :  { %s350_s1 = scalar_lea.vmem %s20_s8, 128  ;;  %p355_p12 = scmp.lt.s32.totalorder %s20_s8, %s20_s8 }
  0x1c   :  { %p351_p11 = scmp.ne.s32.totalorder %s20_s8, %s350_s1  ;;  %p356_p13 = scmp.lt.s32.totalorder %s350_s1, %s350_s1 }
  0x1e   :  { %p357_p0 = por %p356_p13, %p355_p12 }
  0x20   :  { %p358_p1 = pnand %p357_p0, %p351_p11 }
  0x22   :  { %361 = shalt.err (!%p358_p1)
}
  0x23   :  { %22 = dma.hbm_to_vmem [thread:$0]  %s510_s0, 128, %s20_s8, [#allocation3]  }
  0x24   :  { %s362_s22 = scalar_lea.hbm %s513_s3, 1024 }
  0x25   :  { %p363_p2 = scmp.ne.s32.totalorder %s513_s3, %s362_s22  ;;  %p366_p3 = scmp.lt.u32.totalorder %s362_s22, %s513_s3 }
  0x27   :  { %p368_p4 = pnand %p366_p3, %p363_p2 }
  0x29   :  { %371 = shalt.err (!%p368_p4)
}
  0x2a   :  { %s372_s27 = scalar_lea.vmem %s43_s10, 1024  ;;  %p377_p6 = scmp.lt.s32.totalorder %s43_s10, %s43_s10 }
  0x2b   :  { %p373_p5 = scmp.ne.s32.totalorder %s43_s10, %s372_s27  ;;  %p378_p7 = scmp.lt.s32.totalorder %s372_s27, %s372_s27 }
  0x2d   :  { %p379_p8 = por %p378_p7, %p377_p6 }
  0x2f   :  { %p380_p9 = pnand %p379_p8, %p373_p5 }
  0x31   :  { %383 = shalt.err (!%p380_p9)
}
  0x32   :  { %48 = dma.hbm_to_vmem [thread:$0]  %s513_s3, 1024, %s43_s10, [#allocation6], %s413_s28, %s413_s28, %s414_s29  }
  0x33   :  { %406 = dma.done.wait [#allocation3], 128  }
  0x34   :  { %407 = vsyncadd [#allocation3], 4294967168 }
  0x35   :  { %408 = dma.done.wait [#allocation6], 1152  }
  0x36   :  { %409 = vsyncadd [#allocation6], 4294966144  ;;  %v417_v0 = vmov 0.0   ;;  %vm418_vm0 = vmmov 0   ;;  %v309_v1 = vld [vmem:[#allocation5] sm:$0xff]   ;;  %v61_v2 = vld [vmem:[#allocation2] sm:$0xff] }
  0x37   :  { %275 = vmatprep.subr.bf16.mxu0 %v417_v0  ;;  %277 = vmatprep.mubr.msk.bf16.mxu0 %vm418_vm0, %v417_v0  ;;  %v62_v3 = vpack.c.bf16 %v61_v2, %v61_v2  ;;  %vm78_vm1 = vcmask 130048   ;;  %v310_v4 = vld [vmem:[#allocation7] sm:$0xff]   ;;  %v311_v5 = vld [vmem:[#allocation7 + $0x8] sm:$0xff]   ;;  %v312_v6 = vld [vmem:[#allocation7 + $0x10] sm:$0xff]   ;;  %s419_s7 = smov [#allocation8]  }
  0x38   :  { %281 = vmatprep.subr.bf16.mxu1 %v417_v0  ;;  %297 = vmatprep.mubr.msk.bf16.mxu1 %vm418_vm0, %v417_v0  ;;  %v313_v7 = vld [vmem:[#allocation7 + $0x18] sm:$0xff]   ;;  %v314_v8 = vld [vmem:[#allocation7 + $0x20] sm:$0xff]   ;;  %v315_v9 = vld [vmem:[#allocation7 + $0x28] sm:$0xff]   ;;  %s242_s8 = sshll.u32 %s419_s7, 4  ;;  %s243_s8 = int_to_ptr.vmem [resolvable:$true] %s242_s8 }
  0x39   :  { %276 = vmatpush3.bf16.msra.mxu0 %v309_v1  ;;  %282 = vmatpush3.bf16.msra.mxu1 %v310_v4  ;;  %v316_v10 = vld [vmem:[#allocation7 + $0x30] sm:$0xff]   ;;  %v317_v11 = vld [vmem:[#allocation7 + $0x38] sm:$0xff]   ;;  %p389_p11 = scmp.lt.s32.totalorder %s243_s8, %s243_s8 }
  0x3a   :  { %283 = vmatprep.subr.bf16.mxu1 %v417_v0  ;;  %v252_v12 = vld [vmem:[%s512_s2] ss:$0 sm:$0xff]  ;;  %s384_s2 = scalar_lea.vmem %s243_s8, 128 }
  0x3b   :  { %v255_v20 = vld [vmem:[%s514_s4] ss:$0 sm:$0xff]  ;;  %p385_p10 = scmp.ne.s32.totalorder %s243_s8, %s384_s2  ;;  %p390_p12 = scmp.lt.s32.totalorder %s384_s2, %s384_s2 }
  0x3c   :  { %278 = vmatmul.mubr.msk.bf16.vlgmr.msra.gmra.mrb[0].mxu0 %vm78_vm1, %v62_v3 }
  0x3d   :  { %284 = vmatpush3.bf16.msra.mxu1 %v311_v5  ;;  %p391_p13 = por %p390_p12, %p389_p11 }
  0x3e   :  { %285 = vmatprep.subr.bf16.mxu1 %v417_v0 }
  0x3f   :  { %p392_p0 = pnand %p391_p13, %p385_p10 }
  0x41   :  { %286 = vmatpush3.bf16.msra.mxu1 %v312_v6 }
  0x42   :  { %287 = vmatprep.subr.bf16.mxu1 %v417_v0 }
  0x45   :  { %288 = vmatpush3.bf16.msra.mxu1 %v313_v7 }
  0x46   :  { %289 = vmatprep.subr.bf16.mxu1 %v417_v0 }
  0x49   :  { %290 = vmatpush3.bf16.msra.mxu1 %v314_v8 }
  0x4a   :  { %291 = vmatprep.subr.bf16.mxu1 %v417_v0 }
  0x4d   :  { %292 = vmatpush3.bf16.msra.mxu1 %v315_v9 }
  0x4e   :  { %293 = vmatprep.subr.bf16.mxu1 %v417_v0 }
  0x51   :  { %294 = vmatpush3.bf16.msra.mxu1 %v316_v10 }
  0x52   :  { %295 = vmatprep.subr.bf16.mxu1 %v417_v0 }
  0x55   :  { %296 = vmatpush3.bf16.msra.mxu1 %v317_v11 }
 0x10f   :  { %v116_v13 = vpop.f32.mrb[0].mxu0 }
 0x110   :  { %v117_v14 = vadd.f32 %v252_v12, %v116_v13  ;;  %v279_v15 = vpop.f32.mrb[1].mxu0 }
 0x111   :  { %v119_v16 = vpop.f32.mrb[2].mxu0 }
 0x112   :  { %v122_v17 = vmax.f32 %v117_v14, 0.0  ;;  %v280_v18 = vpop.f32.mrb[3].mxu0 }
 0x114   :  { %v123_v19 = vpack.c.bf16 %v122_v17, %v122_v17 }
 0x116   :  { %298 = vmatmul.mubr.bf16.vlgmr.msra.gmra.mrb[0].mxu1 %v123_v19 }
 0x1e9   :  { %v229_v21 = vpop.f32.mrb[0].mxu1 }
 0x1ea   :  { %v230_v22 = vadd.f32 %v255_v20, %v229_v21  ;;  %v299_v23 = vpop.f32.mrb[1].mxu1 }
 0x1eb   :  { %v232_v24 = vpop.f32.mrb[2].mxu1 }
 0x1ec   :  { %235 = vst [vmem:[#allocation8] sm:$0xff] %v230_v22  ;;  %v300_v25 = vpop.f32.mrb[3].mxu1 }
 0x1ed   :  { %395 = shalt.err (!%p392_p0)
}
 0x1ee   :  { %s396_s4 = scalar_lea.hbm %s515_s5, 128 }
 0x1ef   :  { %p397_p1 = scmp.ne.s32.totalorder %s515_s5, %s396_s4  ;;  %p400_p2 = scmp.lt.u32.totalorder %s396_s4, %s515_s5 }
 0x1f1   :  { %p402_p3 = pnand %p400_p2, %p397_p1 }
 0x1f3   :  { %405 = shalt.err (!%p402_p3)
}
 0x1f4   :  { %245 = dma.vmem_to_hbm [thread:$0]  %s243_s8, 128, %s515_s5, [#allocation4]  }
 0x1f5   :  { %410 = dma.done.wait [#allocation4], 128  }
 0x1f6   :  { %411 = vsyncadd [#allocation4], 4294967168 }
 0x1f7   :  { %249 = vsyncpa [#allocation3], 1 }
 0x1f8   :  { %250 = vsyncpa [#allocation6], 1 }
 0x1f9   :  { %251 = vsyncpa [#allocation4], 1 }

</bundles_post_ra>
